<compile_context>
chip_gen: v7x
topology: tpu7x:2x2x1
jax: 0.10.0
libtpu: 0.0.40
codegen_flags: <defaults>
</compile_context>

<pallas_src>
import jax
import jax.numpy as jnp
from jax.experimental import pallas as pl
from jax.experimental.pallas import tpu as pltpu


# -----------------------------------------------------------------------------
# Kernel: fused (folded cnn+fc1) -> 4x hidden -> final head, one batch tile.
# -----------------------------------------------------------------------------
def _ensemble_kernel(x_ref, wf_ref, bf_ref,
                     w2_ref, b2_ref, w3_ref, b3_ref,
                     w4_ref, b4_ref, w5_ref, b5_ref,
                     w6_ref, b6_ref, o_ref):
    # In-kernel bf16 cast of the input tile (hidden under the first matmul).
    x = x_ref[...].astype(jnp.bfloat16)

    def layer(h_bf16, w_ref, b_ref):
        # MXU: bf16 x bf16 -> f32 accumulation; elementwise tail in bf16.
        z = jnp.dot(h_bf16, w_ref[...], preferred_element_type=jnp.float32)
        return jnp.maximum(z.astype(jnp.bfloat16) + b_ref[...], 0.0)

    h = layer(x, wf_ref, bf_ref)        # folded (cnn stand-in @ fc1): L -> 128
    h = layer(h, w2_ref, b2_ref)
    h = layer(h, w3_ref, b3_ref)
    h = layer(h, w4_ref, b4_ref)
    h = layer(h, w5_ref, b5_ref)        # Dropout == identity in eval mode

    # Final Linear(128, 1): VPU multiply + XLU transpose + sublane reduce so the
    # store is a lane-dense (1, tb) row instead of masked (tb, 1) column stores.
    g = h.astype(jnp.float32) * w6_ref[...]            # (tb, 128) f32
    out_row = jnp.sum(g.T, axis=0, keepdims=True)      # (1, tb)
    o_ref[...] = (out_row + b6_ref[...]).astype(o_ref.dtype)


# -----------------------------------------------------------------------------
# pallas_call wrapper: grid over batch tiles, weights VMEM-resident.
# -----------------------------------------------------------------------------
def _fused_fc(x2, kp, tb):
    """x2: (B, L) f32 -> (num_tiles, 1, tb) f32 (tail columns are garbage)."""
    B, L = x2.shape
    num_tiles = pl.cdiv(B, tb)

    flat_args = (
        x2,
        kp["wf"], kp["bf"],
        kp["w2"], kp["b2"], kp["w3"], kp["b3"],
        kp["w4"], kp["b4"], kp["w5"], kp["b5"],
        kp["w6"], kp["b6"],
    )

    def resident(a):
        # Constant block index -> fetched once, stays VMEM-resident across steps.
        return pl.BlockSpec(a.shape, lambda i: (0,) * a.ndim)

    in_specs = ([pl.BlockSpec((tb, L), lambda i: (i, 0))]
                + [resident(a) for a in flat_args[1:]])
    # Lane-dense output slab: block (1, tb) per step (leading dim squeezed).
    out_specs = pl.BlockSpec((None, 1, tb), lambda i: (i, 0, 0))

    flops = 2 * B * (L * 128 + 4 * 128 * 128 + 128)
    weight_bytes = sum(int(a.size) * a.dtype.itemsize for a in flat_args[1:])
    bytes_accessed = (int(x2.size) * x2.dtype.itemsize
                      + num_tiles * tb * 4 + weight_bytes)

    return pl.pallas_call(
        _ensemble_kernel,
        out_shape=jax.ShapeDtypeStruct((num_tiles, 1, tb), jnp.float32),
        grid=(num_tiles,),
        in_specs=in_specs,
        out_specs=out_specs,
        compiler_params=pltpu.CompilerParams(
            dimension_semantics=("parallel",),
            vmem_limit_bytes=32 * 1024 * 1024),
        cost_estimate=pl.CostEstimate(
            flops=flops, transcendentals=0, bytes_accessed=bytes_accessed),
    )(*flat_args)


def peptide_ensemble_forward(x, atom_matrix, kparams, *, block_b=2048):
    """x: (B, L, 1) f32, atom_matrix: (B, L, 5) (unused, as in the reference).

    Returns (B, 1) float32.
    """
    del atom_matrix  # unused in the reference forward()
    B, L, C = x.shape
    x2 = x.reshape(B, L * C)  # keep f32; bf16 cast happens inside the kernel

    # Batch tile: multiple of 128 (lane-dense output, full-width MXU passes),
    # large enough to amortize per-step overhead, capped so the grid keeps
    # >= ~4 steps when B allows (v7x megacore parallelism).
    cap = max(128, ((pl.cdiv(B, 4) + 127) // 128) * 128)
    tb = min(block_b, cap)

    out = _fused_fc(x2, kparams, tb)          # (num_tiles, 1, tb)
    return out.reshape(-1)[:B].reshape(B, 1)  # drop padded tail rows


# -----------------------------------------------------------------------------
# Parameters: PyTorch nn.Linear-style init (f32 masters, weights as (in, out)),
# then fold the linear cnn stand-in into fc1 and cast matmul weights to bf16.
# -----------------------------------------------------------------------------
def init_params(key, seq_len):
    def linear(key, fan_in, fan_out):
        kw, kb = jax.random.split(key)
        bound = 1.0 / jnp.sqrt(fan_in)
        w = jax.random.uniform(kw, (fan_in, fan_out), jnp.float32, -bound, bound)
        b = jax.random.uniform(kb, (1, fan_out), jnp.float32, -bound, bound)
        return w, b

    keys = jax.random.split(key, 7)
    p = {}
    # TODO(synk): EmbeddingCnn1 undefined in the reference; linear stand-in.
    p["w_cnn"], p["b_cnn"] = linear(keys[0], seq_len, 256)
    p["w1"], p["b1"] = linear(keys[1], 256, 128)
    p["w2"], p["b2"] = linear(keys[2], 128, 128)
    p["w3"], p["b3"] = linear(keys[3], 128, 128)
    p["w4"], p["b4"] = linear(keys[4], 128, 128)
    p["w5"], p["b5"] = linear(keys[5], 128, 128)
    p["w6"], p["b6"] = linear(keys[6], 128, 1)
    return p


def pack_params(p):
    """Fold cnn stand-in into fc1 (exact: no nonlinearity between them) and
    cast matmul operands to bf16 for the MXU; final head stays f32."""
    wf = p["w_cnn"] @ p["w1"]            # (L, 128)
    bf = p["b_cnn"] @ p["w1"] + p["b1"]  # (1, 128)
    kp = {
        "wf": wf.astype(jnp.bfloat16),
        "bf": bf.astype(jnp.bfloat16),
        "w6": p["w6"].reshape(1, 128).astype(jnp.float32),  # row vector
        "b6": p["b6"].reshape(1, 1).astype(jnp.float32),
    }
    for i in (2, 3, 4, 5):
        kp[f"w{i}"] = p[f"w{i}"].astype(jnp.bfloat16)
        kp[f"b{i}"] = p[f"b{i}"].astype(jnp.bfloat16)
    return kp


if __name__ == "__main__":
    # Small, module-consistent shapes: batch=8, peptide sequence length=16,
    # peptide_input_dim=1, atom feature dim=5.
    B, L = 8, 16
    key = jax.random.PRNGKey(0)
    k_par, k_x, k_atom = jax.random.split(key, 3)

    params = init_params(k_par, L)
    kparams = pack_params(params)
    x = jax.random.uniform(k_x, (B, L, 1), jnp.float32)
    atom_matrix = jax.random.uniform(k_atom, (B, L, 5), jnp.float32)

    out = peptide_ensemble_forward(x, atom_matrix, kparams)
    out = jax.block_until_ready(out)
    assert out.shape == (B, 1) and out.dtype == jnp.float32
    assert bool(jnp.all(jnp.isfinite(out)))
    print("KERNEL_OK")
</pallas_src>

<mosaic_0001>
module attributes {stable_mosaic.version = 11 : i64} {
  func.func @_ensemble_kernel(%arg0: i32, %arg1: memref<128x16xf32, #tpu.memory_space<vmem>>, %arg2: memref<16x128xbf16, #tpu.memory_space<vmem>>, %arg3: memref<1x128xbf16, #tpu.memory_space<vmem>>, %arg4: memref<128x128xbf16, #tpu.memory_space<vmem>>, %arg5: memref<1x128xbf16, #tpu.memory_space<vmem>>, %arg6: memref<128x128xbf16, #tpu.memory_space<vmem>>, %arg7: memref<1x128xbf16, #tpu.memory_space<vmem>>, %arg8: memref<128x128xbf16, #tpu.memory_space<vmem>>, %arg9: memref<1x128xbf16, #tpu.memory_space<vmem>>, %arg10: memref<128x128xbf16, #tpu.memory_space<vmem>>, %arg11: memref<1x128xbf16, #tpu.memory_space<vmem>>, %arg12: memref<1x128xf32, #tpu.memory_space<vmem>>, %arg13: memref<1x1xf32, #tpu.memory_space<vmem>>, %arg14: memref<1x1x128xf32, #tpu.memory_space<vmem>>) attributes {dimension_semantics = [#tpu.dimension_semantics<parallel>], iteration_bounds = array<i64: 1>, scalar_prefetch = 0 : i64, scratch_operands = 0 : i64, tpu.core_type = #tpu.core_type<tc>, window_params = [{transform_indices = @transform_0, window_bounds = array<i64: 128, 16>}, {pipeline_mode = #tpu.pipeline_mode<synchronous>, transform_indices = @transform_1, window_bounds = array<i64: 16, 128>}, {pipeline_mode = #tpu.pipeline_mode<synchronous>, transform_indices = @transform_2, window_bounds = array<i64: 1, 128>}, {pipeline_mode = #tpu.pipeline_mode<synchronous>, transform_indices = @transform_3, window_bounds = array<i64: 128, 128>}, {pipeline_mode = #tpu.pipeline_mode<synchronous>, transform_indices = @transform_4, window_bounds = array<i64: 1, 128>}, {pipeline_mode = #tpu.pipeline_mode<synchronous>, transform_indices = @transform_5, window_bounds = array<i64: 128, 128>}, {pipeline_mode = #tpu.pipeline_mode<synchronous>, transform_indices = @transform_6, window_bounds = array<i64: 1, 128>}, {pipeline_mode = #tpu.pipeline_mode<synchronous>, transform_indices = @transform_7, window_bounds = array<i64: 128, 128>}, {pipeline_mode = #tpu.pipeline_mode<synchronous>, transform_indices = @transform_8, window_bounds = array<i64: 1, 128>}, {pipeline_mode = #tpu.pipeline_mode<synchronous>, transform_indices = @transform_9, window_bounds = array<i64: 128, 128>}, {pipeline_mode = #tpu.pipeline_mode<synchronous>, transform_indices = @transform_10, window_bounds = array<i64: 1, 128>}, {pipeline_mode = #tpu.pipeline_mode<synchronous>, transform_indices = @transform_11, window_bounds = array<i64: 1, 128>}, {pipeline_mode = #tpu.pipeline_mode<synchronous>, transform_indices = @transform_12, window_bounds = array<i64: 1, 1>}, {transform_indices = @transform_13, window_bounds = array<i64: 1, 1, 128>}]} {
    %c0 = arith.constant 0 : index
    %c0_0 = arith.constant 0 : index
    %0 = vector.load %arg1[%c0, %c0_0] : memref<128x16xf32, #tpu.memory_space<vmem>>, vector<128x16xf32>
    %1 = arith.truncf %0 : vector<128x16xf32> to vector<128x16xbf16>
    %c0_1 = arith.constant 0 : index
    %c0_2 = arith.constant 0 : index
    %2 = vector.load %arg2[%c0_1, %c0_2] : memref<16x128xbf16, #tpu.memory_space<vmem>>, vector<16x128xbf16>
    %cst = arith.constant dense<0.000000e+00> : vector<128x128xf32>
    %3 = tpu.matmul %1, %2, %cst {dimension_numbers = #tpu.dot_dimension_numbers<[1], [0], [0], [1], [0, 0, 1, 1], [], []>} : vector<128x16xbf16>, vector<16x128xbf16>, vector<128x128xf32> -> vector<128x128xf32>
    %4 = arith.truncf %3 : vector<128x128xf32> to vector<128x128xbf16>
    %c0_3 = arith.constant 0 : index
    %c0_4 = arith.constant 0 : index
    %5 = vector.load %arg3[%c0_3, %c0_4] : memref<1x128xbf16, #tpu.memory_space<vmem>>, vector<1x128xbf16>
    %6 = vector.broadcast %5 : vector<1x128xbf16> to vector<128x128xbf16>
    %7 = arith.addf %4, %6 : vector<128x128xbf16>
    %cst_5 = arith.constant 0.000000e+00 : bf16
    %8 = vector.broadcast %cst_5 : bf16 to vector<128x128xbf16>
    %9 = arith.maximumf %7, %8 : vector<128x128xbf16>
    %c0_6 = arith.constant 0 : index
    %c0_7 = arith.constant 0 : index
    %10 = vector.load %arg4[%c0_6, %c0_7] : memref<128x128xbf16, #tpu.memory_space<vmem>>, vector<128x128xbf16>
    %cst_8 = arith.constant dense<0.000000e+00> : vector<128x128xf32>
    %11 = tpu.matmul %9, %10, %cst_8 {dimension_numbers = #tpu.dot_dimension_numbers<[1], [0], [0], [1], [0, 0, 1, 1], [], []>} : vector<128x128xbf16>, vector<128x128xbf16>, vector<128x128xf32> -> vector<128x128xf32>
    %12 = arith.truncf %11 : vector<128x128xf32> to vector<128x128xbf16>
    %c0_9 = arith.constant 0 : index
    %c0_10 = arith.constant 0 : index
    %13 = vector.load %arg5[%c0_9, %c0_10] : memref<1x128xbf16, #tpu.memory_space<vmem>>, vector<1x128xbf16>
    %14 = vector.broadcast %13 : vector<1x128xbf16> to vector<128x128xbf16>
    %15 = arith.addf %12, %14 : vector<128x128xbf16>
    %cst_11 = arith.constant 0.000000e+00 : bf16
    %16 = vector.broadcast %cst_11 : bf16 to vector<128x128xbf16>
    %17 = arith.maximumf %15, %16 : vector<128x128xbf16>
    %c0_12 = arith.constant 0 : index
    %c0_13 = arith.constant 0 : index
    %18 = vector.load %arg6[%c0_12, %c0_13] : memref<128x128xbf16, #tpu.memory_space<vmem>>, vector<128x128xbf16>
    %cst_14 = arith.constant dense<0.000000e+00> : vector<128x128xf32>
    %19 = tpu.matmul %17, %18, %cst_14 {dimension_numbers = #tpu.dot_dimension_numbers<[1], [0], [0], [1], [0, 0, 1, 1], [], []>} : vector<128x128xbf16>, vector<128x128xbf16>, vector<128x128xf32> -> vector<128x128xf32>
    %20 = arith.truncf %19 : vector<128x128xf32> to vector<128x128xbf16>
    %c0_15 = arith.constant 0 : index
    %c0_16 = arith.constant 0 : index
    %21 = vector.load %arg7[%c0_15, %c0_16] : memref<1x128xbf16, #tpu.memory_space<vmem>>, vector<1x128xbf16>
    %22 = vector.broadcast %21 : vector<1x128xbf16> to vector<128x128xbf16>
    %23 = arith.addf %20, %22 : vector<128x128xbf16>
    %cst_17 = arith.constant 0.000000e+00 : bf16
    %24 = vector.broadcast %cst_17 : bf16 to vector<128x128xbf16>
    %25 = arith.maximumf %23, %24 : vector<128x128xbf16>
    %c0_18 = arith.constant 0 : index
    %c0_19 = arith.constant 0 : index
    %26 = vector.load %arg8[%c0_18, %c0_19] : memref<128x128xbf16, #tpu.memory_space<vmem>>, vector<128x128xbf16>
    %cst_20 = arith.constant dense<0.000000e+00> : vector<128x128xf32>
    %27 = tpu.matmul %25, %26, %cst_20 {dimension_numbers = #tpu.dot_dimension_numbers<[1], [0], [0], [1], [0, 0, 1, 1], [], []>} : vector<128x128xbf16>, vector<128x128xbf16>, vector<128x128xf32> -> vector<128x128xf32>
    %28 = arith.truncf %27 : vector<128x128xf32> to vector<128x128xbf16>
    %c0_21 = arith.constant 0 : index
    %c0_22 = arith.constant 0 : index
    %29 = vector.load %arg9[%c0_21, %c0_22] : memref<1x128xbf16, #tpu.memory_space<vmem>>, vector<1x128xbf16>
    %30 = vector.broadcast %29 : vector<1x128xbf16> to vector<128x128xbf16>
    %31 = arith.addf %28, %30 : vector<128x128xbf16>
    %cst_23 = arith.constant 0.000000e+00 : bf16
    %32 = vector.broadcast %cst_23 : bf16 to vector<128x128xbf16>
    %33 = arith.maximumf %31, %32 : vector<128x128xbf16>
    %c0_24 = arith.constant 0 : index
    %c0_25 = arith.constant 0 : index
    %34 = vector.load %arg10[%c0_24, %c0_25] : memref<128x128xbf16, #tpu.memory_space<vmem>>, vector<128x128xbf16>
    %cst_26 = arith.constant dense<0.000000e+00> : vector<128x128xf32>
    %35 = tpu.matmul %33, %34, %cst_26 {dimension_numbers = #tpu.dot_dimension_numbers<[1], [0], [0], [1], [0, 0, 1, 1], [], []>} : vector<128x128xbf16>, vector<128x128xbf16>, vector<128x128xf32> -> vector<128x128xf32>
    %36 = arith.truncf %35 : vector<128x128xf32> to vector<128x128xbf16>
    %c0_27 = arith.constant 0 : index
    %c0_28 = arith.constant 0 : index
    %37 = vector.load %arg11[%c0_27, %c0_28] : memref<1x128xbf16, #tpu.memory_space<vmem>>, vector<1x128xbf16>
    %38 = vector.broadcast %37 : vector<1x128xbf16> to vector<128x128xbf16>
    %39 = arith.addf %36, %38 : vector<128x128xbf16>
    %cst_29 = arith.constant 0.000000e+00 : bf16
    %40 = vector.broadcast %cst_29 : bf16 to vector<128x128xbf16>
    %41 = arith.maximumf %39, %40 : vector<128x128xbf16>
    %42 = arith.extf %41 : vector<128x128xbf16> to vector<128x128xf32>
    %c0_30 = arith.constant 0 : index
    %c0_31 = arith.constant 0 : index
    %43 = vector.load %arg12[%c0_30, %c0_31] : memref<1x128xf32, #tpu.memory_space<vmem>>, vector<1x128xf32>
    %44 = vector.broadcast %43 : vector<1x128xf32> to vector<128x128xf32>
    %45 = arith.mulf %42, %44 : vector<128x128xf32>
    %46 = tpu.transpose %45, [1, 0] : vector<128x128xf32> -> vector<128x128xf32>
    %cst_32 = arith.constant dense<0.000000e+00> : vector<128xf32>
    %47 = vector.multi_reduction <add>, %46, %cst_32 [0] : vector<128x128xf32> to vector<128xf32>
    %48 = vector.shape_cast %47 : vector<128xf32> to vector<1x128xf32>
    %c0_33 = arith.constant 0 : index
    %c0_34 = arith.constant 0 : index
    %49 = vector.load %arg13[%c0_33, %c0_34] : memref<1x1xf32, #tpu.memory_space<vmem>>, vector<1x1xf32>
    %50 = vector.broadcast %49 : vector<1x1xf32> to vector<1x128xf32>
    %51 = arith.addf %48, %50 : vector<1x128xf32>
    %c0_35 = arith.constant 0 : index
    %c0_36 = arith.constant 0 : index
    %c0_37 = arith.constant 0 : index
    %52 = vector.load %arg14[%c0_35, %c0_36, %c0_37] : memref<1x1x128xf32, #tpu.memory_space<vmem>>, vector<1x1x128xf32>
    %53 = vector.shape_cast %52 : vector<1x1x128xf32> to vector<1x128xf32>
    %54 = vector.shape_cast %51 : vector<1x128xf32> to vector<1x1x128xf32>
    tpu.vector_store %arg14[%c0_35, %c0_36, %c0_37], %54 {strides = array<i32>} : memref<1x1x128xf32, #tpu.memory_space<vmem>>, vector<1x1x128xf32>,
    return
  }
  func.func @transform_0(%arg0: i32) -> (i32, i32) {
    %c0_i32 = arith.constant 0 : i32
    %c0_i32_0 = arith.constant 0 : i32
    return %arg0, %c0_i32 : i32, i32
  }
  func.func @transform_1(%arg0: i32) -> (i32, i32) {
    %c0_i32 = arith.constant 0 : i32
    %c0_i32_0 = arith.constant 0 : i32
    %c0_i32_1 = arith.constant 0 : i32
    return %c0_i32, %c0_i32_0 : i32, i32
  }
  func.func @transform_2(%arg0: i32) -> (i32, i32) {
    %c0_i32 = arith.constant 0 : i32
    %c0_i32_0 = arith.constant 0 : i32
    %c0_i32_1 = arith.constant 0 : i32
    return %c0_i32, %c0_i32_0 : i32, i32
  }
  func.func @transform_3(%arg0: i32) -> (i32, i32) {
    %c0_i32 = arith.constant 0 : i32
    %c0_i32_0 = arith.constant 0 : i32
    %c0_i32_1 = arith.constant 0 : i32
    return %c0_i32, %c0_i32_0 : i32, i32
  }
  func.func @transform_4(%arg0: i32) -> (i32, i32) {
    %c0_i32 = arith.constant 0 : i32
    %c0_i32_0 = arith.constant 0 : i32
    %c0_i32_1 = arith.constant 0 : i32
    return %c0_i32, %c0_i32_0 : i32, i32
  }
  func.func @transform_5(%arg0: i32) -> (i32, i32) {
    %c0_i32 = arith.constant 0 : i32
    %c0_i32_0 = arith.constant 0 : i32
    %c0_i32_1 = arith.constant 0 : i32
    return %c0_i32, %c0_i32_0 : i32, i32
  }
  func.func @transform_6(%arg0: i32) -> (i32, i32) {
    %c0_i32 = arith.constant 0 : i32
    %c0_i32_0 = arith.constant 0 : i32
    %c0_i32_1 = arith.constant 0 : i32
    return %c0_i32, %c0_i32_0 : i32, i32
  }
  func.func @transform_7(%arg0: i32) -> (i32, i32) {
    %c0_i32 = arith.constant 0 : i32
    %c0_i32_0 = arith.constant 0 : i32
    %c0_i32_1 = arith.constant 0 : i32
    return %c0_i32, %c0_i32_0 : i32, i32
  }
  func.func @transform_8(%arg0: i32) -> (i32, i32) {
    %c0_i32 = arith.constant 0 : i32
    %c0_i32_0 = arith.constant 0 : i32
    %c0_i32_1 = arith.constant 0 : i32
    return %c0_i32, %c0_i32_0 : i32, i32
  }
  func.func @transform_9(%arg0: i32) -> (i32, i32) {
    %c0_i32 = arith.constant 0 : i32
    %c0_i32_0 = arith.constant 0 : i32
    %c0_i32_1 = arith.constant 0 : i32
    return %c0_i32, %c0_i32_0 : i32, i32
  }
  func.func @transform_10(%arg0: i32) -> (i32, i32) {
    %c0_i32 = arith.constant 0 : i32
    %c0_i32_0 = arith.constant 0 : i32
    %c0_i32_1 = arith.constant 0 : i32
    return %c0_i32, %c0_i32_0 : i32, i32
  }
  func.func @transform_11(%arg0: i32) -> (i32, i32) {
    %c0_i32 = arith.constant 0 : i32
    %c0_i32_0 = arith.constant 0 : i32
    %c0_i32_1 = arith.constant 0 : i32
    return %c0_i32, %c0_i32_0 : i32, i32
  }
  func.func @transform_12(%arg0: i32) -> (i32, i32) {
    %c0_i32 = arith.constant 0 : i32
    %c0_i32_0 = arith.constant 0 : i32
    %c0_i32_1 = arith.constant 0 : i32
    return %c0_i32, %c0_i32_0 : i32, i32
  }
  func.func @transform_13(%arg0: i32) -> (i32, i32, i32) {
    %c0_i32 = arith.constant 0 : i32
    %c0_i32_0 = arith.constant 0 : i32
    %c0_i32_1 = arith.constant 0 : i32
    return %arg0, %c0_i32, %c0_i32_0 : i32, i32, i32
  }
}

</mosaic_0001>

<bundles_post_ra>
// kernel: tpu_custom_call.1
= control target key start
LH: loop header
LB: loop body
LE: loop exit
PB: predicated region body
PF: predicated region fallthrough
CT: control target
= control target key end

     0   :  { %s1970_s0 = inlined_call_operand.hbm [shape: f32[8,16], index: 0, kind: input, shape index: {}]   ;;  %s1971_s1 = inlined_call_operand.hbm [shape: bf16[16,128], index: 1, kind: input, shape index: {}]   ;;  %s1972_s2 = inlined_call_operand.vmem [shape: bf16[1,128], index: 2, kind: input, shape index: {}]   ;;  %s1973_s3 = inlined_call_operand.hbm [shape: bf16[128,128], index: 3, kind: input, shape index: {}]   ;;  %s1974_s4 = inlined_call_operand.vmem [shape: bf16[1,128], index: 4, kind: input, shape index: {}]   ;;  %s1975_s5 = inlined_call_operand.hbm [shape: bf16[128,128], index: 5, kind: input, shape index: {}]   ;;  %s1976_s6 = inlined_call_operand.vmem [shape: bf16[1,128], index: 6, kind: input, shape index: {}]   ;;  %s1977_s7 = inlined_call_operand.hbm [shape: bf16[128,128], index: 7, kind: input, shape index: {}]   ;;  %s1978_s8 = inlined_call_operand.vmem [shape: bf16[1,128], index: 8, kind: input, shape index: {}]   ;;  %s1979_s9 = inlined_call_operand.hbm [shape: bf16[128,128], index: 9, kind: input, shape index: {}]   ;;  %s1980_s10 = inlined_call_operand.vmem [shape: bf16[1,128], index: 10, kind: input, shape index: {}]   ;;  %s1981_s11 = inlined_call_operand.vmem [shape: f32[1,128], index: 11, kind: input, shape index: {}]   ;;  %s1982_s12 = inlined_call_operand.<no memory space> [shape: f32[1,1], index: 12, kind: input, shape index: {}]   ;;  %s1983_s13 = inlined_call_operand.hbm [shape: f32[1,1,128], index: 13, kind: output, shape index: {}]  }
   0x1   :  { %v18_v0 = vstv %s1982_s12 }
   0x2   :  { %19 = vst [vmem:[#allocation2] sm:$0x1] %v18_v0 }
   0x3   :  { %20 = vsyncpa [#allocation4], 0 }
   0x4   :  { %21 = vsyncpa [#allocation7], 0 }
   0x5   :  { %22 = vsyncpa [#allocation10], 0 }
   0x6   :  { %23 = vsyncpa [#allocation13], 0 }
   0x7   :  { %24 = vsyncpa [#allocation5], 0 }
   0x8   :  { %29 = vsyncadd [#allocation4], 1920  ;;  %s1682_s27 = smov [#allocation6]   ;;  %s1518_s14 = scalar_lea.hbm %s1971_s1, 128 }
   0x9   :  { %s42_s28 = sshll.u32 %s1682_s27, 4  ;;  %p1519_p0 = scmp.ne.s32.totalorder %s1971_s1, %s1518_s14  ;;  %s43_s28 = int_to_ptr.vmem [resolvable:$true] %s42_s28 }
   0xa   :  { %p1522_p1 = scmp.lt.u32.totalorder %s1518_s14, %s1971_s1 }
   0xc   :  { %p1524_p2 = pnand %p1522_p1, %p1519_p0 }
   0xe   :  { %1527 = shalt.err (!%p1524_p2)
}
   0xf   :  { %s1528_s18 = scalar_lea.vmem %s43_s28, 128  ;;  %p1533_p4 = scmp.lt.s32.totalorder %s43_s28, %s43_s28 }
  0x10   :  { %p1529_p3 = scmp.ne.s32.totalorder %s43_s28, %s1528_s18  ;;  %p1534_p5 = scmp.lt.s32.totalorder %s1528_s18, %s1528_s18 }
  0x12   :  { %p1535_p6 = por %p1534_p5, %p1533_p4 }
  0x14   :  { %p1536_p7 = pnand %p1535_p6, %p1529_p3 }
  0x16   :  { %1539 = shalt.err (!%p1536_p7)
}
  0x17   :  { %s1683_s19 = smov 64   ;;  %s1684_s20 = smov 4  }
  0x18   :  { %48 = dma.hbm_to_vmem [thread:$0]  %s1971_s1, 128, %s43_s28, [#allocation7], %s1683_s19, %s1683_s19, %s1684_s20  }
  0x19   :  { %s1685_s23 = smov [#allocation9]   ;;  %s1686_s25 = smov [#allocation3]  }
  0x1a   :  { %s70_s24 = sshll.u32 %s1685_s23, 4  ;;  %s30_s26 = sshll.u32 %s1686_s25, 4  ;;  %s71_s24 = int_to_ptr.vmem [resolvable:$true] %s70_s24  ;;  %s31_s26 = int_to_ptr.vmem [resolvable:$true] %s30_s26 }
  0x1b   :  { %s1540_s30 = scalar_lea.hbm %s1975_s5, 1024 }
  0x1c   :  { %p1541_p8 = scmp.ne.s32.totalorder %s1975_s5, %s1540_s30  ;;  %p1544_p9 = scmp.lt.u32.totalorder %s1540_s30, %s1975_s5 }
  0x1e   :  { %p1546_p10 = pnand %p1544_p9, %p1541_p8 }
  0x20   :  { %1549 = shalt.err (!%p1546_p10)
}
  0x21   :  { %s1550_s1 = scalar_lea.vmem %s71_s24, 1024  ;;  %p1555_p12 = scmp.lt.s32.totalorder %s71_s24, %s71_s24 }
  0x22   :  { %p1551_p11 = scmp.ne.s32.totalorder %s71_s24, %s1550_s1  ;;  %p1556_p13 = scmp.lt.s32.totalorder %s1550_s1, %s1550_s1 }
  0x24   :  { %p1557_p0 = por %p1556_p13, %p1555_p12 }
  0x26   :  { %p1558_p1 = pnand %p1557_p0, %p1551_p11 }
  0x28   :  { %1561 = shalt.err (!%p1558_p1)
}
  0x29   :  { %76 = dma.hbm_to_vmem [thread:$0]  %s1975_s5, 1024, %s71_s24, [#allocation10], %s1683_s19, %s1683_s19, %s1684_s20  }
  0x2a   :  { %s1562_s22 = scalar_lea.hbm %s1970_s0, 128 }
  0x2b   :  { %p1563_p2 = scmp.ne.s32.totalorder %s1970_s0, %s1562_s22  ;;  %p1566_p3 = scmp.lt.u32.totalorder %s1562_s22, %s1970_s0 }
  0x2d   :  { %p1568_p4 = pnand %p1566_p3, %p1563_p2 }
  0x2f   :  { %1571 = shalt.err (!%p1568_p4)
}
  0x30   :  { %s1572_s30 = scalar_lea.vmem %s31_s26, 128  ;;  %s1576_s14 = scalar_lea.vmem %s31_s26, 2048 }
  0x31   :  { %p1573_p5 = scmp.ne.s32.totalorder %s31_s26, %s1572_s30  ;;  %p1577_p6 = scmp.lt.s32.totalorder %s31_s26, %s31_s26 }
  0x32   :  { %p1578_p7 = scmp.lt.s32.totalorder %s1576_s14, %s1572_s30 }
  0x34   :  { %p1579_p8 = por %p1578_p7, %p1577_p6 }
  0x36   :  { %p1580_p9 = pnand %p1579_p8, %p1573_p5 }
  0x38   :  { %1583 = shalt.err (!%p1580_p9)
}
  0x39   :  { %s1687_s5 = smov 128   ;;  %s1688_s24 = smov 8  }
  0x3a   :  { %36 = dma.hbm_to_vmem [thread:$0]  %s1970_s0, 128, %s31_s26, [#allocation4], %s1687_s5, %s1687_s5, %s1688_s24  }
  0x3b   :  { %s1689_s17 = smov [#allocation8]   ;;  %s1690_s28 = smov [#allocation11]  }
  0x3c   :  { %s56_s1 = sshll.u32 %s1689_s17, 4  ;;  %s84_s12 = sshll.u32 %s1690_s28, 4  ;;  %s57_s1 = int_to_ptr.vmem [resolvable:$true] %s56_s1  ;;  %s85_s12 = int_to_ptr.vmem [resolvable:$true] %s84_s12 }
  0x3d   :  { %s1584_s22 = scalar_lea.hbm %s1973_s3, 1024 }
  0x3e   :  { %p1585_p10 = scmp.ne.s32.totalorder %s1973_s3, %s1584_s22  ;;  %p1588_p11 = scmp.lt.u32.totalorder %s1584_s22, %s1973_s3 }
  0x40   :  { %p1590_p12 = pnand %p1588_p11, %p1585_p10 }
  0x42   :  { %1593 = shalt.err (!%p1590_p12)
}
  0x43   :  { %s1594_s0 = scalar_lea.vmem %s57_s1, 1024  ;;  %p1599_p0 = scmp.lt.s32.totalorder %s57_s1, %s57_s1 }
  0x44   :  { %p1595_p13 = scmp.ne.s32.totalorder %s57_s1, %s1594_s0  ;;  %p1600_p1 = scmp.lt.s32.totalorder %s1594_s0, %s1594_s0 }
  0x46   :  { %p1601_p2 = por %p1600_p1, %p1599_p0 }
  0x48   :  { %p1602_p3 = pnand %p1601_p2, %p1595_p13 }
  0x4a   :  { %1605 = shalt.err (!%p1602_p3)
}
  0x4b   :  { %62 = dma.hbm_to_vmem [thread:$0]  %s1973_s3, 1024, %s57_s1, [#allocation7], %s1683_s19, %s1683_s19, %s1684_s20  }
  0x4c   :  { %s1606_s24 = scalar_lea.hbm %s1977_s7, 1024 }
  0x4d   :  { %p1607_p4 = scmp.ne.s32.totalorder %s1977_s7, %s1606_s24  ;;  %p1610_p5 = scmp.lt.u32.totalorder %s1606_s24, %s1977_s7 }
  0x4f   :  { %p1612_p6 = pnand %p1610_p5, %p1607_p4 }
  0x51   :  { %1615 = shalt.err (!%p1612_p6)
}
  0x52   :  { %s1616_s18 = scalar_lea.vmem %s85_s12, 1024  ;;  %p1621_p8 = scmp.lt.s32.totalorder %s85_s12, %s85_s12 }
  0x53   :  { %p1617_p7 = scmp.ne.s32.totalorder %s85_s12, %s1616_s18  ;;  %p1622_p9 = scmp.lt.s32.totalorder %s1616_s18, %s1616_s18 }
  0x55   :  { %p1623_p10 = por %p1622_p9, %p1621_p8 }
  0x57   :  { %p1624_p11 = pnand %p1623_p10, %p1617_p7 }
  0x59   :  { %1627 = shalt.err (!%p1624_p11)
}
  0x5a   :  { %90 = dma.hbm_to_vmem [thread:$0]  %s1977_s7, 1024, %s85_s12, [#allocation10], %s1683_s19, %s1683_s19, %s1684_s20  }
  0x5b   :  { %s1691_s21 = smov [#allocation12]   ;;  %s1628_s27 = scalar_lea.hbm %s1979_s9, 1024 }
  0x5c   :  { %s98_s22 = sshll.u32 %s1691_s21, 4  ;;  %p1629_p12 = scmp.ne.s32.totalorder %s1979_s9, %s1628_s27  ;;  %s99_s22 = int_to_ptr.vmem [resolvable:$true] %s98_s22 }
  0x5d   :  { %p1632_p13 = scmp.lt.u32.totalorder %s1628_s27, %s1979_s9 }
  0x5f   :  { %p1634_p0 = pnand %p1632_p13, %p1629_p12 }
  0x61   :  { %1637 = shalt.err (!%p1634_p0)
}
  0x62   :  { %s1638_s14 = scalar_lea.vmem %s99_s22, 1024  ;;  %p1643_p2 = scmp.lt.s32.totalorder %s99_s22, %s99_s22 }
  0x63   :  { %p1639_p1 = scmp.ne.s32.totalorder %s99_s22, %s1638_s14  ;;  %p1644_p3 = scmp.lt.s32.totalorder %s1638_s14, %s1638_s14 }
  0x65   :  { %p1645_p4 = por %p1644_p3, %p1643_p2 }
  0x67   :  { %p1646_p5 = pnand %p1645_p4, %p1639_p1 }
  0x69   :  { %1649 = shalt.err (!%p1646_p5)
}
  0x6a   :  { %104 = dma.hbm_to_vmem [thread:$0]  %s1979_s9, 1024, %s99_s22, [#allocation13], %s1683_s19, %s1683_s19, %s1684_s20  }
  0x6b   :  { %1672 = dma.done.wait [#allocation4], 2048  }
  0x6c   :  { %1673 = vsyncadd [#allocation4], 4294965248 }
  0x6d   :  { %1674 = dma.done.wait [#allocation7], 1152  }
  0x6e   :  { %1675 = vsyncadd [#allocation7], 4294966144 }
  0x6f   :  { %1676 = dma.done.wait [#allocation10], 2048  }
  0x70   :  { %1677 = vsyncadd [#allocation10], 4294965248 }
  0x71   :  { %1678 = dma.done.wait [#allocation13], 1024  }
  0x72   :  { %1679 = vsyncadd [#allocation13], 4294966272  ;;  %v1485_v1 = vld [vmem:[#allocation6] sm:$0xff]   ;;  %v131_v3 = vld [vmem:[#allocation3 + $0x8] sm:$0xff]  ;;  %vm162_vm0 = vcmask 130048   ;;  %v1692_v34 = vmov 0   ;;  %v296_v41 = vlaneseq }
  0x73   :  { %v130_v2 = vld [vmem:[#allocation3] sm:$0xff]  ;;  %v132_v4 = vld [vmem:[#allocation3 + $0x10] sm:$0xff]  ;;  %1325 = vmatprep.subr.bf16.mxu0 %v1485_v1  ;;  %v133_v6 = vld [vmem:[#allocation3 + $0x18] sm:$0xff]  ;;  %1483 = vset.pattern.permute.xlu1 %v1692_v34 }
  0x74   :  { %v146_v5 = vpack.c.bf16 %v131_v3, %v130_v2  ;;  %v134_v7 = vld [vmem:[#allocation3 + $0x20] sm:$0xff]  ;;  %v135_v8 = vld [vmem:[#allocation3 + $0x28] sm:$0xff]  ;;  %1326 = vmatpush3.bf16.msra.mxu0 %v1485_v1  ;;  %v147_v9 = vpack.c.bf16 %v133_v6, %v132_v4  ;;  %v136_v11 = vld [vmem:[#allocation3 + $0x30] sm:$0xff]  ;;  %v297_v42 = vshrl.u32 %v296_v41, 7 }
  0x75   :  { %v148_v10 = vpack.c.bf16 %v135_v8, %v134_v7  ;;  %v137_v12 = vld [vmem:[#allocation3 + $0x38] sm:$0xff]  ;;  %v138_v13 = vld [vmem:[#allocation3 + $0x40] sm:$0xff]  ;;  %v139_v14 = vld [vmem:[#allocation3 + $0x48] sm:$0xff] }
  0x76   :  { %1327 = vmatprep.mubr.msk.bf16.mxu0 %vm162_vm0, %v146_v5  ;;  %v1486_v15 = vld [vmem:[#allocation8] sm:$0xff]   ;;  %v1487_v16 = vld [vmem:[#allocation8 + $0x8] sm:$0xff]   ;;  %v149_v17 = vpack.c.bf16 %v137_v12, %v136_v11  ;;  %v150_v18 = vpack.c.bf16 %v139_v14, %v138_v13  ;;  %v1488_v19 = vld [vmem:[#allocation8 + $0x10] sm:$0xff]   ;;  %v1866_v45 = vsub.s32 0, %v297_v42 }
  0x77   :  { %1328 = vmatmul.mubr.msk.bf16.vlgmr.msra.gmra.mrb[0].mxu0 %vm162_vm0, %v147_v9  ;;  %1343 = vmatprep.subr.bf16.mxu1 %v1486_v15  ;;  %v140_v20 = vld [vmem:[#allocation3 + $0x50] sm:$0xff]  ;;  %v141_v21 = vld [vmem:[#allocation3 + $0x58] sm:$0xff]  ;;  %v1489_v22 = vld [vmem:[#allocation8 + $0x18] sm:$0xff]  }
  0x78   :  { %1331 = vmatprep.mubr.msk.bf16.mxu0 %vm162_vm0, %v148_v10  ;;  %1344 = vmatpush3.bf16.msra.mxu1 %v1486_v15  ;;  %v142_v23 = vld [vmem:[#allocation3 + $0x60] sm:$0xff]  ;;  %v143_v24 = vld [vmem:[#allocation3 + $0x68] sm:$0xff]  ;;  %v151_v26 = vpack.c.bf16 %v141_v21, %v140_v20  ;;  %v144_v28 = vld [vmem:[#allocation3 + $0x70] sm:$0xff] }
  0x79   :  { %1345 = vmatprep.subr.bf16.mxu1 %v1487_v16  ;;  %v1490_v25 = vld [vmem:[#allocation8 + $0x20] sm:$0xff]   ;;  %v152_v27 = vpack.c.bf16 %v143_v24, %v142_v23  ;;  %v145_v29 = vld [vmem:[#allocation3 + $0x78] sm:$0xff]  ;;  %v1491_v30 = vld [vmem:[#allocation8 + $0x28] sm:$0xff]  }
  0x7a   :  { %v153_v31 = vpack.c.bf16 %v145_v29, %v144_v28  ;;  %v1492_v32 = vld [vmem:[#allocation8 + $0x30] sm:$0xff]   ;;  %v1493_v33 = vld [vmem:[#allocation8 + $0x38] sm:$0xff]   ;;  %v1494_v35 = vld [vmem:[#allocation9] sm:$0xff]  }
  0x7b   :  { %v1495_v36 = vld [vmem:[#allocation9 + $0x8] sm:$0xff]   ;;  %1375 = vmatprep.subr.bf16.mxu0 %v1494_v35  ;;  %v1496_v37 = vld [vmem:[#allocation9 + $0x10] sm:$0xff]   ;;  %v1497_v38 = vld [vmem:[#allocation9 + $0x18] sm:$0xff]  }
  0x7c   :  { %1346 = vmatpush3.bf16.msra.mxu1 %v1487_v16  ;;  %1376 = vmatpush3.bf16.msra.mxu0 %v1494_v35  ;;  %v1498_v39 = vld [vmem:[#allocation9 + $0x20] sm:$0xff]   ;;  %v1499_v40 = vld [vmem:[#allocation9 + $0x28] sm:$0xff]   ;;  %v292_v43 = vld [vmem:[%s1972_s2] sm:$0x1] }
  0x7d   :  { %1347 = vmatprep.subr.bf16.mxu1 %v1488_v19  ;;  %1377 = vmatprep.subr.bf16.mxu0 %v1495_v36  ;;  %v294_v44 = vpack.i.b16 %v292_v43, %v292_v43  ;;  %v1500_v23 = vld [vmem:[#allocation9 + $0x30] sm:$0xff]   ;;  %v1501_v24 = vld [vmem:[#allocation9 + $0x38] sm:$0xff]   ;;  %v1506_v29 = vld [vmem:[#allocation11 + $0x20] sm:$0xff]  }
  0x7e   :  { %v1505_v28 = vld [vmem:[#allocation11 + $0x18] sm:$0xff]  }
  0x7f   :  { %1332 = vmatmul.mubr.msk.bf16.gmra.mrb[4].mxu0 %vm162_vm0, %v149_v17  ;;  %v299_v48 = vrot.slane %v294_v44, %v1866_v45 }
  0x80   :  { %1335 = vmatprep.mubr.msk.bf16.mxu0 %vm162_vm0, %v150_v18  ;;  %1348 = vmatpush3.bf16.msra.mxu1 %v1488_v19 }
  0x81   :  { %1349 = vmatprep.subr.bf16.mxu1 %v1489_v22  ;;  %1378 = vmatpush3.bf16.msra.mxu0 %v1495_v36 }
  0x82   :  { %1379 = vmatprep.subr.bf16.mxu0 %v1496_v37 }
  0x84   :  { %1350 = vmatpush3.bf16.msra.mxu1 %v1489_v22 }
  0x85   :  { %1351 = vmatprep.subr.bf16.mxu1 %v1490_v25  ;;  %1380 = vmatpush3.bf16.msra.mxu0 %v1496_v37 }
  0x86   :  { %1381 = vmatprep.subr.bf16.mxu0 %v1497_v38 }
  0x87   :  { %1336 = vmatmul.mubr.msk.bf16.gmra.mrb[8].mxu0 %vm162_vm0, %v151_v26  ;;  %v1503_v26 = vld [vmem:[#allocation11 + $0x8] sm:$0xff]  }
  0x88   :  { %1339 = vmatprep.mubr.msk.bf16.mxu0 %vm162_vm0, %v152_v27  ;;  %1352 = vmatpush3.bf16.msra.mxu1 %v1490_v25  ;;  %v1502_v25 = vld [vmem:[#allocation11] sm:$0xff]   ;;  %v1504_v27 = vld [vmem:[#allocation11 + $0x10] sm:$0xff]  }
  0x89   :  { %1353 = vmatprep.subr.bf16.mxu1 %v1491_v30  ;;  %1382 = vmatpush3.bf16.msra.mxu0 %v1497_v38 }
  0x8a   :  { %1383 = vmatprep.subr.bf16.mxu0 %v1498_v39 }
  0x8c   :  { %1354 = vmatpush3.bf16.msra.mxu1 %v1491_v30  ;;  %v1507_v30 = vld [vmem:[#allocation11 + $0x28] sm:$0xff]  }
  0x8d   :  { %1355 = vmatprep.subr.bf16.mxu1 %v1492_v32  ;;  %1384 = vmatpush3.bf16.msra.mxu0 %v1498_v39 }
  0x8e   :  { %1385 = vmatprep.subr.bf16.mxu0 %v1499_v40 }
  0x8f   :  { %1340 = vmatmul.mubr.msk.bf16.gmra.mrb[12].mxu0 %vm162_vm0, %v153_v31  ;;  %v485_v31 = vld [vmem:[%s1974_s4] sm:$0x1] }
  0x90   :  { %1356 = vmatpush3.bf16.msra.mxu1 %v1492_v32  ;;  %v487_v32 = vpack.i.b16 %v485_v31, %v485_v31 }
  0x91   :  { %1357 = vmatprep.subr.bf16.mxu1 %v1493_v33  ;;  %1386 = vmatpush3.bf16.msra.mxu0 %v1499_v40 }
  0x92   :  { %1387 = vmatprep.subr.bf16.mxu0 %v1500_v23  ;;  %v492_v36 = vrot.slane %v487_v32, %v1866_v45 }
  0x94   :  { %1358 = vmatpush3.bf16.msra.mxu1 %v1493_v33 }
  0x95   :  { %1388 = vmatpush3.bf16.msra.mxu0 %v1500_v23  ;;  %1407 = vmatprep.subr.bf16.mxu1 %v1502_v25 }
  0x96   :  { %1389 = vmatprep.subr.bf16.mxu0 %v1501_v24 }
  0x99   :  { %1390 = vmatpush3.bf16.msra.mxu0 %v1501_v24 }
 0x14a   :  { %v1329_v46 = vpop.f32.mrb[0].mxu0 }
 0x14b   :  { %v221_v47 = vpop.f32.mrb[1].mxu0 }
 0x14c   :  { %v1330_v49 = vpop.f32.mrb[2].mxu0 }
 0x14d   :  { %v285_v50 = vpack.c.bf16 %v1330_v49, %v1329_v46  ;;  %v224_v51 = vpop.f32.mrb[3].mxu0 }
 0x14e   :  { %v284_v52 = vpack.c.bf16 %v224_v51, %v221_v47 }
 0x14f   :  { %v301_v53 = vadd.bf16 %v299_v48, %v285_v50 }
 0x150   :  { %v300_v54 = vadd.bf16 %v299_v48, %v284_v52 }
 0x151   :  { %v309_v58 = vmax.bf16 %v1692_v34, %v301_v53 }
 0x152   :  { %v1333_v55 = vpop.f32.mrb[4].mxu0  ;;  %v308_v56 = vmax.bf16 %v1692_v34, %v300_v54 }
 0x153   :  { %v237_v57 = vpop.f32.mrb[5].mxu0 }
 0x154   :  { %v1334_v59 = vpop.f32.mrb[6].mxu0  ;;  %1359 = vmatprep.mubr.bf16.mxu1 %v308_v56 }
 0x155   :  { %v287_v60 = vpack.c.bf16 %v1334_v59, %v1333_v55  ;;  %v240_v61 = vpop.f32.mrb[7].mxu0  ;;  %1360 = vmatmul.mubr.bf16.vlgmr.msra.gmra.mrb[0].mxu1 %v309_v58 }
 0x156   :  { %v286_v62 = vpack.c.bf16 %v240_v61, %v237_v57  ;;  %1408 = vmatpush3.bf16.msra.mxu1 %v1502_v25 }
 0x157   :  { %v303_v63 = vadd.bf16 %v299_v48, %v287_v60  ;;  %1409 = vmatprep.subr.bf16.mxu1 %v1503_v26 }
 0x158   :  { %v302_v0 = vadd.bf16 %v299_v48, %v286_v62 }
 0x159   :  { %v311_v1 = vmax.bf16 %v1692_v34, %v303_v63 }
 0x15a   :  { %v1337_v2 = vpop.f32.mrb[8].mxu0  ;;  %v310_v3 = vmax.bf16 %v1692_v34, %v302_v0  ;;  %1410 = vmatpush3.bf16.msra.mxu1 %v1503_v26 }
 0x15b   :  { %v253_v4 = vpop.f32.mrb[9].mxu0  ;;  %1411 = vmatprep.subr.bf16.mxu1 %v1504_v27 }
 0x15c   :  { %v1338_v5 = vpop.f32.mrb[10].mxu0  ;;  %1363 = vmatprep.mubr.bf16.mxu1 %v310_v3 }
 0x15d   :  { %v289_v6 = vpack.c.bf16 %v1338_v5, %v1337_v2  ;;  %v256_v7 = vpop.f32.mrb[11].mxu0  ;;  %1364 = vmatmul.mubr.bf16.gmra.mrb[4].mxu1 %v311_v1 }
 0x15e   :  { %v288_v8 = vpack.c.bf16 %v256_v7, %v253_v4  ;;  %1412 = vmatpush3.bf16.msra.mxu1 %v1504_v27 }
 0x15f   :  { %v305_v9 = vadd.bf16 %v299_v48, %v289_v6  ;;  %1413 = vmatprep.subr.bf16.mxu1 %v1505_v28 }
 0x160   :  { %v304_v10 = vadd.bf16 %v299_v48, %v288_v8 }
 0x161   :  { %v313_v11 = vmax.bf16 %v1692_v34, %v305_v9 }
 0x162   :  { %v312_v12 = vmax.bf16 %v1692_v34, %v304_v10  ;;  %v1341_v13 = vpop.f32.mrb[12].mxu0  ;;  %1414 = vmatpush3.bf16.msra.mxu1 %v1505_v28 }
 0x163   :  { %v269_v14 = vpop.f32.mrb[13].mxu0  ;;  %1415 = vmatprep.subr.bf16.mxu1 %v1506_v29 }
 0x164   :  { %1367 = vmatprep.mubr.bf16.mxu1 %v312_v12  ;;  %v1342_v15 = vpop.f32.mrb[14].mxu0  ;;  %v1508_v12 = vld [vmem:[#allocation11 + $0x30] sm:$0xff]  }
 0x165   :  { %1368 = vmatmul.mubr.bf16.gmra.mrb[8].mxu1 %v313_v11  ;;  %v291_v16 = vpack.c.bf16 %v1342_v15, %v1341_v13  ;;  %v272_v17 = vpop.f32.mrb[15].mxu0  ;;  %v1509_v13 = vld [vmem:[#allocation11 + $0x38] sm:$0xff]   ;;  %v1511_v15 = vld [vmem:[#allocation12 + $0x8] sm:$0xff]  }
 0x166   :  { %v290_v18 = vpack.c.bf16 %v272_v17, %v269_v14  ;;  %1416 = vmatpush3.bf16.msra.mxu1 %v1506_v29  ;;  %v1510_v14 = vld [vmem:[#allocation12] sm:$0xff]   ;;  %v1513_v17 = vld [vmem:[#allocation12 + $0x18] sm:$0xff]  }
 0x167   :  { %v307_v19 = vadd.bf16 %v299_v48, %v291_v16  ;;  %1417 = vmatprep.subr.bf16.mxu1 %v1507_v30  ;;  %1439 = vmatprep.subr.bf16.mxu0 %v1510_v14  ;;  %v1512_v16 = vld [vmem:[#allocation12 + $0x10] sm:$0xff]  }
 0x168   :  { %v306_v20 = vadd.bf16 %v299_v48, %v290_v18  ;;  %v1514_v18 = vld [vmem:[#allocation12 + $0x20] sm:$0xff]  }
 0x169   :  { %v315_v21 = vmax.bf16 %v1692_v34, %v307_v19  ;;  %v1515_v19 = vld [vmem:[#allocation12 + $0x28] sm:$0xff]  }
 0x16a   :  { %v314_v22 = vmax.bf16 %v1692_v34, %v306_v20  ;;  %1418 = vmatpush3.bf16.msra.mxu1 %v1507_v30  ;;  %v678_v20 = vld [vmem:[%s1976_s6] sm:$0x1] }
 0x16b   :  { %1419 = vmatprep.subr.bf16.mxu1 %v1508_v12 }
 0x16c   :  { %1371 = vmatprep.mubr.bf16.mxu1 %v314_v22 }
 0x16d   :  { %1372 = vmatmul.mubr.bf16.gmra.mrb[12].mxu1 %v315_v21  ;;  %v680_v21 = vpack.i.b16 %v678_v20, %v678_v20 }
 0x16e   :  { %1420 = vmatpush3.bf16.msra.mxu1 %v1508_v12 }
 0x16f   :  { %1421 = vmatprep.subr.bf16.mxu1 %v1509_v13  ;;  %v685_v24 = vrot.slane %v680_v21, %v1866_v45 }
 0x172   :  { %1422 = vmatpush3.bf16.msra.mxu1 %v1509_v13 }
 0x228   :  { %v1361_v33 = vpop.f32.mrb[0].mxu1 }
 0x229   :  { %v414_v35 = vpop.f32.mrb[1].mxu1 }
 0x22a   :  { %v1362_v37 = vpop.f32.mrb[2].mxu1 }
 0x22b   :  { %v478_v38 = vpack.c.bf16 %v1362_v37, %v1361_v33  ;;  %v417_v39 = vpop.f32.mrb[3].mxu1 }
 0x22c   :  { %v477_v40 = vpack.c.bf16 %v417_v39, %v414_v35 }
 0x22d   :  { %v494_v41 = vadd.bf16 %v492_v36, %v478_v38 }
 0x22e   :  { %v493_v42 = vadd.bf16 %v492_v36, %v477_v40 }
 0x22f   :  { %v502_v46 = vmax.bf16 %v1692_v34, %v494_v41 }
 0x230   :  { %v1365_v43 = vpop.f32.mrb[4].mxu1  ;;  %v501_v44 = vmax.bf16 %v1692_v34, %v493_v42 }
 0x231   :  { %v430_v47 = vpop.f32.mrb[5].mxu1 }
 0x232   :  { %v1366_v48 = vpop.f32.mrb[6].mxu1  ;;  %1391 = vmatprep.mubr.bf16.mxu0 %v501_v44 }
 0x233   :  { %v480_v49 = vpack.c.bf16 %v1366_v48, %v1365_v43  ;;  %v433_v50 = vpop.f32.mrb[7].mxu1  ;;  %1392 = vmatmul.mubr.bf16.vlgmr.msra.gmra.mrb[16].mxu0 %v502_v46 }
 0x234   :  { %v479_v51 = vpack.c.bf16 %v433_v50, %v430_v47  ;;  %1440 = vmatpush3.bf16.msra.mxu0 %v1510_v14 }
 0x235   :  { %v496_v52 = vadd.bf16 %v492_v36, %v480_v49  ;;  %1441 = vmatprep.subr.bf16.mxu0 %v1511_v15 }
 0x236   :  { %v495_v53 = vadd.bf16 %v492_v36, %v479_v51 }
 0x237   :  { %v504_v54 = vmax.bf16 %v1692_v34, %v496_v52 }
 0x238   :  { %v1369_v55 = vpop.f32.mrb[8].mxu1  ;;  %v503_v56 = vmax.bf16 %v1692_v34, %v495_v53  ;;  %1442 = vmatpush3.bf16.msra.mxu0 %v1511_v15 }
 0x239   :  { %v446_v57 = vpop.f32.mrb[9].mxu1  ;;  %1443 = vmatprep.subr.bf16.mxu0 %v1512_v16 }
 0x23a   :  { %v1370_v58 = vpop.f32.mrb[10].mxu1  ;;  %1395 = vmatprep.mubr.bf16.mxu0 %v503_v56 }
 0x23b   :  { %v482_v59 = vpack.c.bf16 %v1370_v58, %v1369_v55  ;;  %v449_v60 = vpop.f32.mrb[11].mxu1  ;;  %1396 = vmatmul.mubr.bf16.gmra.mrb[20].mxu0 %v504_v54 }
 0x23c   :  { %v481_v61 = vpack.c.bf16 %v449_v60, %v446_v57  ;;  %1444 = vmatpush3.bf16.msra.mxu0 %v1512_v16 }
 0x23d   :  { %v498_v62 = vadd.bf16 %v492_v36, %v482_v59  ;;  %1445 = vmatprep.subr.bf16.mxu0 %v1513_v17 }
 0x23e   :  { %v497_v63 = vadd.bf16 %v492_v36, %v481_v61 }
 0x23f   :  { %v506_v0 = vmax.bf16 %v1692_v34, %v498_v62 }
 0x240   :  { %v505_v1 = vmax.bf16 %v1692_v34, %v497_v63  ;;  %v1373_v2 = vpop.f32.mrb[12].mxu1  ;;  %1446 = vmatpush3.bf16.msra.mxu0 %v1513_v17 }
 0x241   :  { %v462_v3 = vpop.f32.mrb[13].mxu1  ;;  %1447 = vmatprep.subr.bf16.mxu0 %v1514_v18 }
 0x242   :  { %1399 = vmatprep.mubr.bf16.mxu0 %v505_v1  ;;  %v1374_v4 = vpop.f32.mrb[14].mxu1  ;;  %v1516_v1 = vld [vmem:[#allocation12 + $0x30] sm:$0xff]  }
 0x243   :  { %1400 = vmatmul.mubr.bf16.gmra.mrb[24].mxu0 %v506_v0  ;;  %v484_v5 = vpack.c.bf16 %v1374_v4, %v1373_v2  ;;  %v465_v6 = vpop.f32.mrb[15].mxu1  ;;  %v1517_v2 = vld [vmem:[#allocation12 + $0x38] sm:$0xff]  }
 0x244   :  { %v483_v7 = vpack.c.bf16 %v465_v6, %v462_v3  ;;  %1448 = vmatpush3.bf16.msra.mxu0 %v1514_v18  ;;  %v871_v3 = vld [vmem:[%s1978_s8] sm:$0x1] }
 0x245   :  { %v500_v8 = vadd.bf16 %v492_v36, %v484_v5  ;;  %1449 = vmatprep.subr.bf16.mxu0 %v1515_v19  ;;  %v873_v4 = vpack.i.b16 %v871_v3, %v871_v3 }
 0x246   :  { %v499_v9 = vadd.bf16 %v492_v36, %v483_v7 }
 0x247   :  { %v508_v10 = vmax.bf16 %v1692_v34, %v500_v8  ;;  %v878_v7 = vrot.slane %v873_v4, %v1866_v45 }
 0x248   :  { %v507_v11 = vmax.bf16 %v1692_v34, %v499_v9  ;;  %1450 = vmatpush3.bf16.msra.mxu0 %v1515_v19 }
 0x249   :  { %1451 = vmatprep.subr.bf16.mxu0 %v1516_v1 }
 0x24a   :  { %1403 = vmatprep.mubr.bf16.mxu0 %v507_v11 }
 0x24b   :  { %1404 = vmatmul.mubr.bf16.gmra.mrb[28].mxu0 %v508_v10 }
 0x24c   :  { %1452 = vmatpush3.bf16.msra.mxu0 %v1516_v1 }
 0x24d   :  { %1453 = vmatprep.subr.bf16.mxu0 %v1517_v2 }
 0x250   :  { %1454 = vmatpush3.bf16.msra.mxu0 %v1517_v2 }
 0x306   :  { %v1393_v22 = vpop.f32.mrb[16].mxu0 }
 0x307   :  { %v607_v23 = vpop.f32.mrb[17].mxu0 }
 0x308   :  { %v1394_v25 = vpop.f32.mrb[18].mxu0 }
 0x309   :  { %v671_v26 = vpack.c.bf16 %v1394_v25, %v1393_v22  ;;  %v610_v27 = vpop.f32.mrb[19].mxu0 }
 0x30a   :  { %v670_v28 = vpack.c.bf16 %v610_v27, %v607_v23 }
 0x30b   :  { %v687_v29 = vadd.bf16 %v685_v24, %v671_v26 }
 0x30c   :  { %v686_v30 = vadd.bf16 %v685_v24, %v670_v28 }
 0x30d   :  { %v695_v33 = vmax.bf16 %v1692_v34, %v687_v29 }
 0x30e   :  { %v1397_v31 = vpop.f32.mrb[20].mxu0  ;;  %v694_v32 = vmax.bf16 %v1692_v34, %v686_v30 }
 0x30f   :  { %v623_v35 = vpop.f32.mrb[21].mxu0 }
 0x310   :  { %v1398_v36 = vpop.f32.mrb[22].mxu0  ;;  %1423 = vmatprep.mubr.bf16.mxu1 %v694_v32 }
 0x311   :  { %v673_v37 = vpack.c.bf16 %v1398_v36, %v1397_v31  ;;  %v626_v38 = vpop.f32.mrb[23].mxu0  ;;  %1424 = vmatmul.mubr.bf16.vlgmr.msra.gmra.mrb[16].mxu1 %v695_v33 }
 0x312   :  { %v672_v39 = vpack.c.bf16 %v626_v38, %v623_v35 }
 0x313   :  { %v689_v40 = vadd.bf16 %v685_v24, %v673_v37 }
 0x314   :  { %v688_v41 = vadd.bf16 %v685_v24, %v672_v39 }
 0x315   :  { %v697_v46 = vmax.bf16 %v1692_v34, %v689_v40 }
 0x316   :  { %v1401_v42 = vpop.f32.mrb[24].mxu0  ;;  %v696_v43 = vmax.bf16 %v1692_v34, %v688_v41 }
 0x317   :  { %v639_v44 = vpop.f32.mrb[25].mxu0 }
 0x318   :  { %v1402_v47 = vpop.f32.mrb[26].mxu0  ;;  %1427 = vmatprep.mubr.bf16.mxu1 %v696_v43 }
 0x319   :  { %v675_v48 = vpack.c.bf16 %v1402_v47, %v1401_v42  ;;  %v642_v49 = vpop.f32.mrb[27].mxu0  ;;  %1428 = vmatmul.mubr.bf16.gmra.mrb[20].mxu1 %v697_v46 }
 0x31a   :  { %v674_v50 = vpack.c.bf16 %v642_v49, %v639_v44  ;;  %v1064_v49 = vld [vmem:[%s1980_s10] sm:$0x1] }
 0x31b   :  { %v691_v51 = vadd.bf16 %v685_v24, %v675_v48  ;;  %v1180_v48 = vld [vmem:[#allocation2] sm:$0x1] }
 0x31c   :  { %v690_v52 = vadd.bf16 %v685_v24, %v674_v50  ;;  %1183 = vperm.xlu1 %1483, %v1180_v48   ;;  %v1066_v50 = vpack.i.b16 %v1064_v49, %v1064_v49 }
 0x31d   :  { %v699_v53 = vmax.bf16 %v1692_v34, %v691_v51 }
 0x31e   :  { %v698_v54 = vmax.bf16 %v1692_v34, %v690_v52  ;;  %v1405_v55 = vpop.f32.mrb[28].mxu0 }
 0x31f   :  { %v655_v56 = vpop.f32.mrb[29].mxu0 }
 0x320   :  { %1431 = vmatprep.mubr.bf16.mxu1 %v698_v54  ;;  %v1406_v57 = vpop.f32.mrb[30].mxu0  ;;  %v1917_v54 = vrot.slane %v1066_v50, %v1866_v45 }
 0x321   :  { %1432 = vmatmul.mubr.bf16.gmra.mrb[24].mxu1 %v699_v53  ;;  %v677_v58 = vpack.c.bf16 %v1406_v57, %v1405_v55  ;;  %v658_v59 = vpop.f32.mrb[31].mxu0 }
 0x322   :  { %v676_v60 = vpack.c.bf16 %v658_v59, %v655_v56 }
 0x323   :  { %v693_v61 = vadd.bf16 %v685_v24, %v677_v58 }
 0x324   :  { %v692_v62 = vadd.bf16 %v685_v24, %v676_v60 }
 0x325   :  { %v701_v63 = vmax.bf16 %v1692_v34, %v693_v61 }
 0x326   :  { %v700_v0 = vmax.bf16 %v1692_v34, %v692_v62 }
 0x328   :  { %1435 = vmatprep.mubr.bf16.mxu1 %v700_v0 }
 0x329   :  { %1436 = vmatmul.mubr.bf16.gmra.mrb[28].mxu1 %v701_v63  ;;  %v1925_v63 = vld [vmem:[%s1981_s11] ss:$0 sm:$0xff]  ;;  %s1693_s11 = smov [#allocation14]  }
 0x32a   :  { %s1198_s17 = sshll.u32 %s1693_s11, 4  ;;  %s1199_s17 = int_to_ptr.vmem [resolvable:$true] %s1198_s17 }
 0x32b   :  { %s1650_s28 = scalar_lea.vmem %s1199_s17, 16  ;;  %s1654_s18 = scalar_lea.vmem %s1199_s17, 32 }
 0x32c   :  { %p1651_p6 = scmp.ne.s32.totalorder %s1199_s17, %s1650_s28  ;;  %p1655_p7 = scmp.lt.s32.totalorder %s1199_s17, %s1199_s17 }
 0x32d   :  { %p1656_p8 = scmp.lt.s32.totalorder %s1654_s18, %s1650_s28 }
 0x32f   :  { %p1657_p9 = por %p1656_p8, %p1655_p7 }
 0x331   :  { %p1658_p10 = pnand %p1657_p9, %p1651_p6 }
 0x3e4   :  { %v1425_v5 = vpop.f32.mrb[16].mxu1 }
 0x3e5   :  { %v800_v6 = vpop.f32.mrb[17].mxu1 }
 0x3e6   :  { %v1426_v8 = vpop.f32.mrb[18].mxu1 }
 0x3e7   :  { %v864_v9 = vpack.c.bf16 %v1426_v8, %v1425_v5  ;;  %v803_v10 = vpop.f32.mrb[19].mxu1 }
 0x3e8   :  { %v863_v11 = vpack.c.bf16 %v803_v10, %v800_v6 }
 0x3e9   :  { %v880_v12 = vadd.bf16 %v878_v7, %v864_v9 }
 0x3ea   :  { %v879_v13 = vadd.bf16 %v878_v7, %v863_v11 }
 0x3eb   :  { %v888_v16 = vmax.bf16 %v1692_v34, %v880_v12 }
 0x3ec   :  { %v1429_v14 = vpop.f32.mrb[20].mxu1  ;;  %v887_v15 = vmax.bf16 %v1692_v34, %v879_v13 }
 0x3ed   :  { %v816_v17 = vpop.f32.mrb[21].mxu1 }
 0x3ee   :  { %v1430_v18 = vpop.f32.mrb[22].mxu1  ;;  %1455 = vmatprep.mubr.bf16.mxu0 %v887_v15 }
 0x3ef   :  { %v866_v19 = vpack.c.bf16 %v1430_v18, %v1429_v14  ;;  %v819_v20 = vpop.f32.mrb[23].mxu1  ;;  %1456 = vmatmul.mubr.bf16.vlgmr.msra.gmra.mrb[32].mxu0 %v888_v16 }
 0x3f0   :  { %v865_v21 = vpack.c.bf16 %v819_v20, %v816_v17 }
 0x3f1   :  { %v882_v22 = vadd.bf16 %v878_v7, %v866_v19 }
 0x3f2   :  { %v881_v23 = vadd.bf16 %v878_v7, %v865_v21 }
 0x3f3   :  { %v890_v27 = vmax.bf16 %v1692_v34, %v882_v22 }
 0x3f4   :  { %v1433_v24 = vpop.f32.mrb[24].mxu1  ;;  %v889_v25 = vmax.bf16 %v1692_v34, %v881_v23 }
 0x3f5   :  { %v832_v26 = vpop.f32.mrb[25].mxu1 }
 0x3f6   :  { %v1434_v28 = vpop.f32.mrb[26].mxu1  ;;  %1459 = vmatprep.mubr.bf16.mxu0 %v889_v25 }
 0x3f7   :  { %v868_v29 = vpack.c.bf16 %v1434_v28, %v1433_v24  ;;  %v835_v30 = vpop.f32.mrb[27].mxu1  ;;  %1460 = vmatmul.mubr.bf16.gmra.mrb[36].mxu0 %v890_v27 }
 0x3f8   :  { %v867_v31 = vpack.c.bf16 %v835_v30, %v832_v26 }
 0x3f9   :  { %v884_v32 = vadd.bf16 %v878_v7, %v868_v29 }
 0x3fa   :  { %v883_v33 = vadd.bf16 %v878_v7, %v867_v31 }
 0x3fb   :  { %v892_v35 = vmax.bf16 %v1692_v34, %v884_v32 }
 0x3fc   :  { %v891_v36 = vmax.bf16 %v1692_v34, %v883_v33  ;;  %v1437_v37 = vpop.f32.mrb[28].mxu1 }
 0x3fd   :  { %v848_v38 = vpop.f32.mrb[29].mxu1 }
 0x3fe   :  { %1463 = vmatprep.mubr.bf16.mxu0 %v891_v36  ;;  %v1438_v39 = vpop.f32.mrb[30].mxu1 }
 0x3ff   :  { %1464 = vmatmul.mubr.bf16.gmra.mrb[40].mxu0 %v892_v35  ;;  %v870_v40 = vpack.c.bf16 %v1438_v39, %v1437_v37  ;;  %v851_v41 = vpop.f32.mrb[31].mxu1 }
 0x400   :  { %v869_v42 = vpack.c.bf16 %v851_v41, %v848_v38 }
 0x401   :  { %v886_v43 = vadd.bf16 %v878_v7, %v870_v40 }
 0x402   :  { %v885_v44 = vadd.bf16 %v878_v7, %v869_v42 }
 0x403   :  { %v894_v46 = vmax.bf16 %v1692_v34, %v886_v43 }
 0x404   :  { %v893_v47 = vmax.bf16 %v1692_v34, %v885_v44 }
 0x406   :  { %1467 = vmatprep.mubr.bf16.mxu0 %v893_v47 }
 0x407   :  { %1468 = vmatmul.mubr.bf16.gmra.mrb[44].mxu0 %v894_v46 }
 0x4c2   :  { %v1457_v51 = vpop.f32.mrb[32].mxu0 }
 0x4c3   :  { %v993_v52 = vpop.f32.mrb[33].mxu0 }
 0x4c4   :  { %v1458_v53 = vpop.f32.mrb[34].mxu0 }
 0x4c5   :  { %v1057_v55 = vpack.c.bf16 %v1458_v53, %v1457_v51  ;;  %v996_v56 = vpop.f32.mrb[35].mxu0 }
 0x4c6   :  { %v1056_v57 = vpack.c.bf16 %v996_v56, %v993_v52 }
 0x4c7   :  { %v1073_v59 = vadd.bf16 %v1917_v54, %v1057_v55 }
 0x4c8   :  { %v1072_v58 = vadd.bf16 %v1917_v54, %v1056_v57 }
 0x4c9   :  { %v1081_v4 = vmax.bf16 %v1692_v34, %v1073_v59 }
 0x4ca   :  { %v1461_v60 = vpop.f32.mrb[36].mxu0  ;;  %v1080_v61 = vmax.bf16 %v1692_v34, %v1072_v58 }
 0x4cb   :  { %v1009_v62 = vpop.f32.mrb[37].mxu0  ;;  %v1090_v11 = vunpack.c.l.bf16 %v1081_v4  ;;  %v1091_v19 = vunpack.c.h.bf16 %v1081_v4 }
 0x4cc   :  { %v1462_v0 = vpop.f32.mrb[38].mxu0  ;;  %v1088_v1 = vunpack.c.l.bf16 %v1080_v61  ;;  %v1089_v7 = vunpack.c.h.bf16 %v1080_v61 }
 0x4cd   :  { %v1059_v2 = vpack.c.bf16 %v1462_v0, %v1461_v60  ;;  %v1012_v3 = vpop.f32.mrb[39].mxu0  ;;  %v1113_v18 = vmul.f32 %v1925_v63, %v1090_v11  ;;  %v1114_v21 = vmul.f32 %v1925_v63, %v1091_v19 }
 0x4ce   :  { %v1058_v5 = vpack.c.bf16 %v1012_v3, %v1009_v62  ;;  %v1111_v6 = vmul.f32 %v1925_v63, %v1088_v1  ;;  %v1112_v10 = vmul.f32 %v1925_v63, %v1089_v7 }
 0x4cf   :  { %v1075_v20 = vadd.bf16 %v1917_v54, %v1059_v2 }
 0x4d0   :  { %1127 = vxpose.xlu0.b32.start [1/16] %v1111_v6, 128  ;;  %v1074_v8 = vadd.bf16 %v1917_v54, %v1058_v5 }
 0x4d1   :  { %v1083_v28 = vmax.bf16 %v1692_v34, %v1075_v20 }
 0x4d2   :  { %v1465_v9 = vpop.f32.mrb[40].mxu0  ;;  %v1082_v16 = vmax.bf16 %v1692_v34, %v1074_v8 }
 0x4d3   :  { %v1025_v12 = vpop.f32.mrb[41].mxu0  ;;  %v1094_v35 = vunpack.c.l.bf16 %v1083_v28  ;;  %v1095_v38 = vunpack.c.h.bf16 %v1083_v28 }
 0x4d4   :  { %1128 = vxpose.xlu0.b32.cont [2/16] %v1112_v10, 128  ;;  %v1466_v13 = vpop.f32.mrb[42].mxu0  ;;  %v1092_v23 = vunpack.c.l.bf16 %v1082_v16  ;;  %v1093_v31 = vunpack.c.h.bf16 %v1082_v16 }
 0x4d5   :  { %v1061_v14 = vpack.c.bf16 %v1466_v13, %v1465_v9  ;;  %v1028_v15 = vpop.f32.mrb[43].mxu0  ;;  %v1117_v37 = vmul.f32 %v1925_v63, %v1094_v35  ;;  %v1118_v40 = vmul.f32 %v1925_v63, %v1095_v38 }
 0x4d6   :  { %v1060_v17 = vpack.c.bf16 %v1028_v15, %v1025_v12  ;;  %v1115_v29 = vmul.f32 %v1925_v63, %v1092_v23  ;;  %v1116_v33 = vmul.f32 %v1925_v63, %v1093_v31 }
 0x4d7   :  { %v1077_v39 = vadd.bf16 %v1917_v54, %v1061_v14 }
 0x4d8   :  { %1129 = vxpose.xlu0.b32.cont [3/16] %v1113_v18, 128  ;;  %v1076_v32 = vadd.bf16 %v1917_v54, %v1060_v17 }
 0x4d9   :  { %v1085_v42 = vmax.bf16 %v1692_v34, %v1077_v39 }
 0x4da   :  { %v1469_v22 = vpop.f32.mrb[44].mxu0  ;;  %v1084_v36 = vmax.bf16 %v1692_v34, %v1076_v32  ;;  %v1184_v32 = vpop.permute.xlu1 %1183 }
 0x4db   :  { %v1041_v24 = vpop.f32.mrb[45].mxu0  ;;  %v1098_v48 = vunpack.c.l.bf16 %v1085_v42  ;;  %v1099_v51 = vunpack.c.h.bf16 %v1085_v42 }
 0x4dc   :  { %1130 = vxpose.xlu0.b32.cont [4/16] %v1114_v21, 128  ;;  %v1470_v25 = vpop.f32.mrb[46].mxu0  ;;  %v1096_v41 = vunpack.c.l.bf16 %v1084_v36  ;;  %v1097_v44 = vunpack.c.h.bf16 %v1084_v36  ;;  %v1189_v36 = vrot.slane %v1184_v32, %v1866_v45 }
 0x4dd   :  { %v1063_v26 = vpack.c.bf16 %v1470_v25, %v1469_v22  ;;  %v1044_v27 = vpop.f32.mrb[47].mxu0  ;;  %v1121_v50 = vmul.f32 %v1925_v63, %v1098_v48  ;;  %v1122_v53 = vmul.f32 %v1925_v63, %v1099_v51 }
 0x4de   :  { %v1062_v30 = vpack.c.bf16 %v1044_v27, %v1041_v24  ;;  %v1119_v43 = vmul.f32 %v1925_v63, %v1096_v41  ;;  %v1120_v47 = vmul.f32 %v1925_v63, %v1097_v44 }
 0x4df   :  { %v1079_v52 = vadd.bf16 %v1917_v54, %v1063_v26 }
 0x4e0   :  { %1131 = vxpose.xlu0.b32.cont [5/16] %v1115_v29, 128  ;;  %v1078_v46 = vadd.bf16 %v1917_v54, %v1062_v30 }
 0x4e1   :  { %v1087_v56 = vmax.bf16 %v1692_v34, %v1079_v52 }
 0x4e2   :  { %v1086_v49 = vmax.bf16 %v1692_v34, %v1078_v46 }
 0x4e3   :  { %v1102_v60 = vunpack.c.l.bf16 %v1087_v56  ;;  %v1103_v62 = vunpack.c.h.bf16 %v1087_v56 }
 0x4e4   :  { %1132 = vxpose.xlu0.b32.cont [6/16] %v1116_v33, 128  ;;  %v1100_v55 = vunpack.c.l.bf16 %v1086_v49  ;;  %v1101_v58 = vunpack.c.h.bf16 %v1086_v49 }
 0x4e5   :  { %v1125_v61 = vmul.f32 %v1925_v63, %v1102_v60  ;;  %v1126_v54 = vmul.f32 %v1925_v63, %v1103_v62 }
 0x4e6   :  { %v1123_v57 = vmul.f32 %v1925_v63, %v1100_v55  ;;  %v1124_v59 = vmul.f32 %v1925_v63, %v1101_v58 }
 0x4e8   :  { %1133 = vxpose.xlu0.b32.cont [7/16] %v1117_v37, 128 }
 0x4ec   :  { %1134 = vxpose.xlu0.b32.cont [8/16] %v1118_v40, 128 }
 0x4f0   :  { %1135 = vxpose.xlu0.b32.cont [9/16] %v1119_v43, 128 }
 0x4f4   :  { %1136 = vxpose.xlu0.b32.cont [10/16] %v1120_v47, 128 }
 0x4f8   :  { %1137 = vxpose.xlu0.b32.cont [11/16] %v1121_v50, 128 }
 0x4fc   :  { %1138 = vxpose.xlu0.b32.cont [12/16] %v1122_v53, 128 }
 0x500   :  { %1139 = vxpose.xlu0.b32.cont [13/16] %v1123_v57, 128 }
 0x504   :  { %1140 = vxpose.xlu0.b32.cont [14/16] %v1124_v59, 128 }
 0x508   :  { %1141 = vxpose.xlu0.b32.cont [15/16] %v1125_v61, 128 }
 0x50c   :  { %1142 = vxpose.xlu0.b32.end [16/16] %v1126_v54, 128 }
 0x535   :  { %1484 = vset.pattern.permute.xlu0 %v1692_v34 }
 0x550   :  { %v1143_v0 = vpop.trf.xlu0 }
 0x554   :  { %v1144_v1 = vpop.trf.xlu0 }
 0x555   :  { %v1159_v9 = vadd.f32 %v1144_v1, %v1143_v0 }
 0x558   :  { %v1145_v2 = vpop.trf.xlu0 }
 0x559   :  { %v1160_v10 = vadd.f32 %v1159_v9, %v1145_v2 }
 0x55c   :  { %v1146_v3 = vpop.trf.xlu0 }
 0x55d   :  { %v1161_v12 = vadd.f32 %v1160_v10, %v1146_v3 }
 0x560   :  { %v1147_v4 = vpop.trf.xlu0 }
 0x561   :  { %v1162_v13 = vadd.f32 %v1161_v12, %v1147_v4 }
 0x564   :  { %v1148_v5 = vpop.trf.xlu0 }
 0x565   :  { %v1163_v15 = vadd.f32 %v1162_v13, %v1148_v5 }
 0x568   :  { %v1149_v6 = vpop.trf.xlu0 }
 0x569   :  { %v1164_v63 = vadd.f32 %v1163_v15, %v1149_v6 }
 0x56c   :  { %v1150_v7 = vpop.trf.xlu0 }
 0x56d   :  { %v1165_v17 = vadd.f32 %v1164_v63, %v1150_v7 }
 0x570   :  { %v1151_v8 = vpop.trf.xlu0 }
 0x571   :  { %v1166_v34 = vadd.f32 %v1165_v17, %v1151_v8 }
 0x574   :  { %v1152_v11 = vpop.trf.xlu0 }
 0x575   :  { %v1167_v19 = vadd.f32 %v1166_v34, %v1152_v11 }
 0x578   :  { %v1153_v14 = vpop.trf.xlu0 }
 0x579   :  { %v1168_v20 = vadd.f32 %v1167_v19, %v1153_v14 }
 0x57c   :  { %v1154_v16 = vpop.trf.xlu0 }
 0x57d   :  { %v1169_v22 = vadd.f32 %v1168_v20, %v1154_v16 }
 0x580   :  { %v1155_v18 = vpop.trf.xlu0 }
 0x581   :  { %v1170_v23 = vadd.f32 %v1169_v22, %v1155_v18 }
 0x584   :  { %v1156_v21 = vpop.trf.xlu0 }
 0x585   :  { %v1171_v25 = vadd.f32 %v1170_v23, %v1156_v21 }
 0x588   :  { %v1157_v24 = vpop.trf.xlu0 }
 0x589   :  { %v1172_v26 = vadd.f32 %v1171_v25, %v1157_v24 }
 0x58c   :  { %v1158_v27 = vpop.trf.xlu0 }
 0x58d   :  { %v1173_v28 = vadd.f32 %v1172_v26, %v1158_v27 }
 0x58f   :  { %v1174_v29 = vrot.slane %v1173_v28, 4 }
 0x591   :  { %v1175_v30 = vadd.f32 %v1174_v29, %v1173_v28 }
 0x593   :  { %v1176_v31 = vrot.slane %v1175_v30, 2 }
 0x595   :  { %v1177_v33 = vadd.f32 %v1176_v31, %v1175_v30 }
 0x597   :  { %v1178_v35 = vrot.slane %v1177_v33, 1 }
 0x599   :  { %v1179_v37 = vadd.f32 %v1178_v35, %v1177_v33 }
 0x59b   :  { %v1190_v38 = vadd.f32 %v1189_v36, %v1179_v37 }
 0x59d   :  { %1191 = vst [vmem:[#allocation14] sm:$0x1] %v1190_v38 }
 0x59e   :  { %1661 = shalt.err (!%p1658_p10)
}
 0x59f   :  { %s1662_s21 = scalar_lea.hbm %s1983_s13, 16 }
 0x5a0   :  { %p1663_p11 = scmp.ne.s32.totalorder %s1983_s13, %s1662_s21  ;;  %p1666_p12 = scmp.lt.u32.totalorder %s1662_s21, %s1983_s13 }
 0x5a2   :  { %p1668_p13 = pnand %p1666_p12, %p1663_p11 }
 0x5a4   :  { %1671 = shalt.err (!%p1668_p13)
}
 0x5a5   :  { %1201 = dma.vmem_to_hbm [thread:$0]  %s1199_s17, 16, %s1983_s13, [#allocation5]  }
 0x5a6   :  { %1680 = dma.done.wait [#allocation5], 16  }
 0x5a7   :  { %1681 = vsyncadd [#allocation5], 4294967280 }
 0x5a8   :  { %1205 = vsyncpa [#allocation4], 1 }
 0x5a9   :  { %1206 = vsyncpa [#allocation7], 1 }
 0x5aa   :  { %1207 = vsyncpa [#allocation10], 1 }
 0x5ab   :  { %1208 = vsyncpa [#allocation13], 1 }
 0x5ac   :  { %1209 = vsyncpa [#allocation5], 1 }

</bundles_post_ra>
